<compile_context>
chip_gen: v7x
topology: tpu7x:2x2x1
jax: 0.10.0
libtpu: 0.0.40
codegen_flags: <defaults>
</compile_context>

<pallas_src>
import math

import jax
import jax.numpy as jnp
from jax.experimental import pallas as pl
from jax.experimental.pallas import tpu as pltpu


_TARGET_BLOCK_BYTES = 4 << 20     # ~85% of HBM roofline per measured tiling data
_MAX_FUSED_BLOCK_BYTES = 8 << 20  # 4x (in+out, double-buffered) = 32 MiB <= v7x VMEM
_LANE_CHUNK_BYTES_CAP = 2048      # lanes per streamed chunk inside the kernel


def _pick_lane_chunk(hw):
    """Largest multiple-of-128 divisor of hw that is <= 2048 (or hw itself)."""
    if hw <= _LANE_CHUNK_BYTES_CAP:
        return hw
    for d in range(_LANE_CHUNK_BYTES_CAP, 127, -128):
        if hw % d == 0:
            return d
    # TODO(synk): non-128-aligned huge HW falls back to a single chunk.
    return hw


def _pick_nb(n, per_image_bytes):
    """Images per block: ~_TARGET_BLOCK_BYTES, divides n, keeps >=2 grid steps."""
    cap = max(1, int(_TARGET_BLOCK_BYTES // max(1, per_image_bytes)))
    cap = min(cap, n)
    if n >= 2:
        cap = min(cap, max(1, n // 2))   # >= 2 "parallel" steps for v7x's 2 TCs
    nb = 1
    for d in range(1, cap + 1):
        if n % d == 0:
            nb = d
    return nb


def _pick_hw_tile(hw, c, itemsize, budget=2 << 20):
    """HW tile for the two-phase path (prefer lane-dense multiples of 128)."""
    cap = max(1, budget // (c * itemsize))
    if hw <= cap:
        return hw
    best = 1
    for d in range(128, cap + 1, 128):
        if hw % d == 0:
            best = d
    if best > 1:
        return best
    for d in range(1, cap + 1):
        if hw % d == 0:
            best = d
    return best


# ------------------------------------------------------------------
# Fused kernel: Nb images per grid step, two chunked streaming passes.
# ------------------------------------------------------------------
def _calayer_fused_kernel(x_ref, w1_ref, b1_ref, w2_ref, b2_ref, o_ref):
    # x_ref : (Nb, C, HW)   channels on sublanes, pixels on lanes
    # w1_ref: (C, Cr)   b1_ref: (1, Cr)   w2_ref: (Cr, C)   b2_ref: (1, C)
    # o_ref : (Nb, C, HW)
    nb, c, hw = x_ref.shape
    hw_chunk = _pick_lane_chunk(hw)
    n_chunks = hw // hw_chunk
    inv_hw = 1.0 / float(hw)

    # ---- pass 1: per-image per-channel sums (chunked so live range stays small)
    def pool_body(k, acc):
        off = pl.multiple_of(k * hw_chunk, hw_chunk)
        xc = x_ref[:, :, pl.ds(off, hw_chunk)]
        return acc + jnp.sum(xc.astype(jnp.float32), axis=2)

    sums = jax.lax.fori_loop(0, n_chunks, pool_body,
                             jnp.zeros((nb, c), jnp.float32), unroll=True)
    m = sums * inv_hw                                          # (Nb, C) f32

    # ---- batched squeeze-excite FCs (one matmul for all Nb images) ----
    h = jnp.dot(m, w1_ref[...], preferred_element_type=jnp.float32) + b1_ref[...]
    h = jnp.maximum(h, 0.0)                                    # (Nb, Cr)
    s = jnp.dot(h, w2_ref[...], preferred_element_type=jnp.float32) + b2_ref[...]
    s = jax.nn.sigmoid(s)                                      # (Nb, C)
    s = s[:, :, None]                                          # broadcast over lanes

    # ---- pass 2: stream x again, rescale, lane-dense store ----
    def scale_body(k, carry):
        off = pl.multiple_of(k * hw_chunk, hw_chunk)
        xc = x_ref[:, :, pl.ds(off, hw_chunk)]
        o_ref[:, :, pl.ds(off, hw_chunk)] = (
            xc.astype(jnp.float32) * s).astype(o_ref.dtype)
        return carry

    jax.lax.fori_loop(0, n_chunks, scale_body, 0, unroll=True)


# ------------------------------------------------------------------
# Two-phase fallback kernels (for images too large for one VMEM block).
# ------------------------------------------------------------------
def _pool_kernel(x_ref, s_ref):
    # x_ref: (1, C, hw_tile); s_ref: (1, C, 1) f32 accumulator across hw tiles
    @pl.when(pl.program_id(1) == 0)
    def _():
        s_ref[...] = jnp.zeros_like(s_ref)
    s_ref[...] += jnp.sum(x_ref[...].astype(jnp.float32), axis=2, keepdims=True)


def _rescale_kernel(x_ref, s_ref, o_ref):
    # x_ref: (1, C, hw_tile); s_ref: (1, C, 1); o_ref: (1, C, hw_tile)
    o_ref[...] = (x_ref[...].astype(jnp.float32) * s_ref[...]).astype(o_ref.dtype)


# ------------------------------------------------------------------
# Wrapper
# ------------------------------------------------------------------
def ca_layer(x_nchw, w1, b1, w2, b2, *, force_two_phase=False, hw_tile=None):
    """CALayer forward.  x_nchw: (N, C, H, W); w1: (Cr, C); w2: (C, Cr)."""
    N, C, H, W = x_nchw.shape
    HW = H * W
    Cr = w1.shape[0]
    itemsize = jnp.dtype(x_nchw.dtype).itemsize

    x2 = x_nchw.reshape(N, C, HW)                  # free view for contiguous NCHW
    w1t = jnp.asarray(w1, jnp.float32).T           # (C, Cr)
    w2t = jnp.asarray(w2, jnp.float32).T           # (Cr, C)
    b1r = jnp.asarray(b1, jnp.float32).reshape(1, Cr)
    b2r = jnp.asarray(b2, jnp.float32).reshape(1, C)

    per_image = C * HW * itemsize
    use_fused = (per_image <= _MAX_FUSED_BLOCK_BYTES) and not force_two_phase

    if use_fused:
        nb = _pick_nb(N, per_image)
        block_bytes = nb * per_image
        vmem_limit = int(min(48 << 20, max(16 << 20, 4 * block_bytes + (2 << 20))))
        out = pl.pallas_call(
            _calayer_fused_kernel,
            out_shape=jax.ShapeDtypeStruct((N, C, HW), x_nchw.dtype),
            grid=(N // nb,),
            in_specs=[
                pl.BlockSpec((nb, C, HW), lambda n: (n, 0, 0)),
                pl.BlockSpec((C, Cr), lambda n: (0, 0)),
                pl.BlockSpec((1, Cr), lambda n: (0, 0)),
                pl.BlockSpec((Cr, C), lambda n: (0, 0)),
                pl.BlockSpec((1, C), lambda n: (0, 0)),
            ],
            out_specs=pl.BlockSpec((nb, C, HW), lambda n: (n, 0, 0)),
            compiler_params=pltpu.CompilerParams(
                dimension_semantics=("parallel",),
                vmem_limit_bytes=vmem_limit),
        )(x2, w1t, b1r, w2t, b2r)
        return out.reshape(N, C, H, W)

    # ---- two-phase path: HW-tiled pool, tiny FC in plain JAX, HW-tiled rescale
    if hw_tile is None:
        hw_tile = _pick_hw_tile(HW, C, itemsize)
    assert HW % hw_tile == 0, (HW, hw_tile)
    n_t = HW // hw_tile

    sums = pl.pallas_call(
        _pool_kernel,
        out_shape=jax.ShapeDtypeStruct((N, C, 1), jnp.float32),
        grid=(N, n_t),
        in_specs=[pl.BlockSpec((1, C, hw_tile), lambda n, t: (n, 0, t))],
        out_specs=pl.BlockSpec((1, C, 1), lambda n, t: (n, 0, 0)),
        compiler_params=pltpu.CompilerParams(
            dimension_semantics=("parallel", "arbitrary")),
    )(x2)

    means = sums[:, :, 0] * (1.0 / float(HW))                     # (N, C) f32
    h = jnp.maximum(means @ w1t + b1r, 0.0)                       # (N, Cr)
    s = jax.nn.sigmoid(h @ w2t + b2r)                             # (N, C)
    s3 = s.reshape(N, C, 1).astype(jnp.float32)

    out = pl.pallas_call(
        _rescale_kernel,
        out_shape=jax.ShapeDtypeStruct((N, C, HW), x_nchw.dtype),
        grid=(N, n_t),
        in_specs=[pl.BlockSpec((1, C, hw_tile), lambda n, t: (n, 0, t)),
                  pl.BlockSpec((1, C, 1), lambda n, t: (n, 0, 0))],
        out_specs=pl.BlockSpec((1, C, hw_tile), lambda n, t: (n, 0, t)),
        compiler_params=pltpu.CompilerParams(
            dimension_semantics=("parallel", "parallel")),
    )(x2, s3)
    return out.reshape(N, C, H, W)


# ------------------------------------------------------------------
# Parameter init (mirrors nn.Conv2d default uniform init, deterministic)
# ------------------------------------------------------------------
def init_ca_layer(key, channel=64, reduction=16):
    cr = channel // reduction
    k1w, k1b, k2w, k2b = jax.random.split(key, 4)
    bound1 = 1.0 / math.sqrt(channel)
    bound2 = 1.0 / math.sqrt(cr)
    w1 = jax.random.uniform(k1w, (cr, channel), jnp.float32, -bound1, bound1)
    b1 = jax.random.uniform(k1b, (cr,), jnp.float32, -bound1, bound1)
    w2 = jax.random.uniform(k2w, (channel, cr), jnp.float32, -bound2, bound2)
    b2 = jax.random.uniform(k2b, (channel,), jnp.float32, -bound2, bound2)
    return {"w1": w1, "b1": b1, "w2": w2, "b2": b2}


# ------------------------------------------------------------------
# Pure-JAX reference (for correctness check)
# ------------------------------------------------------------------
def ca_layer_ref(x, w1, b1, w2, b2):
    xf = x.astype(jnp.float32)
    y = jnp.mean(xf, axis=(2, 3), keepdims=True)                  # (N,C,1,1)
    h = jnp.einsum("nchw,oc->nohw", y, w1) + b1.reshape(1, -1, 1, 1)
    h = jnp.maximum(h, 0.0)
    s = jnp.einsum("nchw,oc->nohw", h, w2) + b2.reshape(1, -1, 1, 1)
    s = jax.nn.sigmoid(s)
    return xf * s


# ------------------------------------------------------------------
# Demo
# ------------------------------------------------------------------
if __name__ == "__main__":
    key = jax.random.PRNGKey(0)
    k_param, k_x = jax.random.split(key)

    batch, channel, reduction, spatial = 2, 64, 16, 16
    params = init_ca_layer(k_param, channel=channel, reduction=reduction)
    x = jax.random.normal(k_x, (batch, channel, spatial, spatial), jnp.float32)

    ref = jax.block_until_ready(ca_layer_ref(x, **params))

    # 1) fused f32 path
    out = jax.block_until_ready(ca_layer(x, **params))
    assert out.shape == x.shape, out.shape
    assert bool(jnp.all(jnp.isfinite(out)))
    assert bool(jnp.allclose(out, ref, rtol=1e-5, atol=1e-5)), (
        float(jnp.max(jnp.abs(out - ref))))

    # 2) bf16 streaming path (halves HBM bytes; f32 accumulation in-kernel)
    out_bf = jax.block_until_ready(ca_layer(x.astype(jnp.bfloat16), **params))
    assert out_bf.dtype == jnp.bfloat16
    assert bool(jnp.allclose(out_bf.astype(jnp.float32), ref,
                             rtol=2e-2, atol=2e-2))

    # 3) two-phase (large-image) fallback path, forced here to exercise it
    out_tp = jax.block_until_ready(
        ca_layer(x, **params, force_two_phase=True, hw_tile=128))
    assert bool(jnp.allclose(out_tp, ref, rtol=1e-5, atol=1e-5)), (
        float(jnp.max(jnp.abs(out_tp - ref))))

    print("KERNEL_OK")
</pallas_src>

<mosaic_0001>
module attributes {stable_mosaic.version = 11 : i64} {
  func.func @_calayer_fused_kernel(%arg0: i32, %arg1: memref<1x64x256xf32, #tpu.memory_space<vmem>>, %arg2: memref<64x4xf32, #tpu.memory_space<vmem>>, %arg3: memref<1x4xf32, #tpu.memory_space<vmem>>, %arg4: memref<4x64xf32, #tpu.memory_space<vmem>>, %arg5: memref<1x64xf32, #tpu.memory_space<vmem>>, %arg6: memref<1x64x256xf32, #tpu.memory_space<vmem>>) attributes {dimension_semantics = [#tpu.dimension_semantics<parallel>], iteration_bounds = array<i64: 2>, scalar_prefetch = 0 : i64, scratch_operands = 0 : i64, tpu.core_type = #tpu.core_type<tc>, window_params = [{transform_indices = @transform_0, window_bounds = array<i64: 1, 64, 256>}, {pipeline_mode = #tpu.pipeline_mode<synchronous>, transform_indices = @transform_1, window_bounds = array<i64: 64, 4>}, {pipeline_mode = #tpu.pipeline_mode<synchronous>, transform_indices = @transform_2, window_bounds = array<i64: 1, 4>}, {pipeline_mode = #tpu.pipeline_mode<synchronous>, transform_indices = @transform_3, window_bounds = array<i64: 4, 64>}, {pipeline_mode = #tpu.pipeline_mode<synchronous>, transform_indices = @transform_4, window_bounds = array<i64: 1, 64>}, {transform_indices = @transform_5, window_bounds = array<i64: 1, 64, 256>}]} {
    %cst = arith.constant 0.000000e+00 : f32
    %0 = vector.broadcast %cst : f32 to vector<1x64xf32>
    %c0_i32 = arith.constant 0 : i32
    %c256_i32 = arith.constant 256 : i32
    %1 = arith.muli %c0_i32, %c256_i32 : i32
    %2 = tpu.assume_multiple %1, 256 : i32
    %c0 = arith.constant 0 : index
    %c0_0 = arith.constant 0 : index
    %3 = arith.index_cast %2 : i32 to index
    %4 = vector.load %arg1[%c0, %c0_0, %3] : memref<1x64x256xf32, #tpu.memory_space<vmem>>, vector<1x64x256xf32>
    %cst_1 = arith.constant dense<0.000000e+00> : vector<1x64xf32>
    %5 = vector.multi_reduction <add>, %4, %cst_1 [2] : vector<1x64x256xf32> to vector<1x64xf32>
    %6 = arith.addf %0, %5 : vector<1x64xf32>
    %c1_i32 = arith.constant 1 : i32
    %cst_2 = arith.constant 3.906250e-03 : f32
    %7 = vector.broadcast %cst_2 : f32 to vector<1x64xf32>
    %8 = arith.mulf %6, %7 : vector<1x64xf32>
    %c0_3 = arith.constant 0 : index
    %c0_4 = arith.constant 0 : index
    %9 = vector.load %arg2[%c0_3, %c0_4] : memref<64x4xf32, #tpu.memory_space<vmem>>, vector<64x4xf32>
    %cst_5 = arith.constant dense<0.000000e+00> : vector<1x4xf32>
    %10 = tpu.matmul %8, %9, %cst_5 {dimension_numbers = #tpu.dot_dimension_numbers<[1], [0], [0], [1], [0, 0, 1, 1], [], []>} : vector<1x64xf32>, vector<64x4xf32>, vector<1x4xf32> -> vector<1x4xf32>
    %c0_6 = arith.constant 0 : index
    %c0_7 = arith.constant 0 : index
    %11 = vector.load %arg3[%c0_6, %c0_7] : memref<1x4xf32, #tpu.memory_space<vmem>>, vector<1x4xf32>
    %12 = arith.addf %10, %11 : vector<1x4xf32>
    %cst_8 = arith.constant 0.000000e+00 : f32
    %13 = vector.broadcast %cst_8 : f32 to vector<1x4xf32>
    %14 = arith.maximumf %12, %13 : vector<1x4xf32>
    %c0_9 = arith.constant 0 : index
    %c0_10 = arith.constant 0 : index
    %15 = vector.load %arg4[%c0_9, %c0_10] : memref<4x64xf32, #tpu.memory_space<vmem>>, vector<4x64xf32>
    %cst_11 = arith.constant dense<0.000000e+00> : vector<1x64xf32>
    %16 = tpu.matmul %14, %15, %cst_11 {dimension_numbers = #tpu.dot_dimension_numbers<[1], [0], [0], [1], [0, 0, 1, 1], [], []>} : vector<1x4xf32>, vector<4x64xf32>, vector<1x64xf32> -> vector<1x64xf32>
    %c0_12 = arith.constant 0 : index
    %c0_13 = arith.constant 0 : index
    %17 = vector.load %arg5[%c0_12, %c0_13] : memref<1x64xf32, #tpu.memory_space<vmem>>, vector<1x64xf32>
    %18 = arith.addf %16, %17 : vector<1x64xf32>
    %19 = arith.negf %18 : vector<1x64xf32>
    %20 = math.exp %19 : vector<1x64xf32>
    %cst_14 = arith.constant 1.000000e+00 : f32
    %21 = vector.broadcast %cst_14 : f32 to vector<1x64xf32>
    %22 = arith.addf %21, %20 : vector<1x64xf32>
    %23 = arith.divf %21, %22 : vector<1x64xf32>
    %24 = vector.shape_cast %23 : vector<1x64xf32> to vector<1x64x1xf32>
    %c0_i32_15 = arith.constant 0 : i32
    %c256_i32_16 = arith.constant 256 : i32
    %25 = arith.muli %c0_i32_15, %c256_i32_16 : i32
    %26 = tpu.assume_multiple %25, 256 : i32
    %c0_17 = arith.constant 0 : index
    %c0_18 = arith.constant 0 : index
    %27 = arith.index_cast %26 : i32 to index
    %28 = vector.load %arg1[%c0_17, %c0_18, %27] : memref<1x64x256xf32, #tpu.memory_space<vmem>>, vector<1x64x256xf32>
    %29 = vector.broadcast %24 : vector<1x64x1xf32> to vector<1x64x256xf32>
    %30 = arith.mulf %28, %29 : vector<1x64x256xf32>
    %c0_19 = arith.constant 0 : index
    %c0_20 = arith.constant 0 : index
    %31 = arith.index_cast %26 : i32 to index
    %32 = vector.load %arg6[%c0_19, %c0_20, %31] : memref<1x64x256xf32, #tpu.memory_space<vmem>>, vector<1x64x256xf32>
    tpu.vector_store %arg6[%c0_19, %c0_20, %31], %30 {strides = array<i32>} : memref<1x64x256xf32, #tpu.memory_space<vmem>>, vector<1x64x256xf32>,
    %c1_i32_21 = arith.constant 1 : i32
    return
  }
  func.func @transform_0(%arg0: i32) -> (i32, i32, i32) {
    %c0_i32 = arith.constant 0 : i32
    %c0_i32_0 = arith.constant 0 : i32
    %c0_i32_1 = arith.constant 0 : i32
    return %arg0, %c0_i32, %c0_i32_0 : i32, i32, i32
  }
  func.func @transform_1(%arg0: i32) -> (i32, i32) {
    %c0_i32 = arith.constant 0 : i32
    %c0_i32_0 = arith.constant 0 : i32
    %c0_i32_1 = arith.constant 0 : i32
    return %c0_i32, %c0_i32_0 : i32, i32
  }
  func.func @transform_2(%arg0: i32) -> (i32, i32) {
    %c0_i32 = arith.constant 0 : i32
    %c0_i32_0 = arith.constant 0 : i32
    %c0_i32_1 = arith.constant 0 : i32
    return %c0_i32, %c0_i32_0 : i32, i32
  }
  func.func @transform_3(%arg0: i32) -> (i32, i32) {
    %c0_i32 = arith.constant 0 : i32
    %c0_i32_0 = arith.constant 0 : i32
    %c0_i32_1 = arith.constant 0 : i32
    return %c0_i32, %c0_i32_0 : i32, i32
  }
  func.func @transform_4(%arg0: i32) -> (i32, i32) {
    %c0_i32 = arith.constant 0 : i32
    %c0_i32_0 = arith.constant 0 : i32
    %c0_i32_1 = arith.constant 0 : i32
    return %c0_i32, %c0_i32_0 : i32, i32
  }
  func.func @transform_5(%arg0: i32) -> (i32, i32, i32) {
    %c0_i32 = arith.constant 0 : i32
    %c0_i32_0 = arith.constant 0 : i32
    %c0_i32_1 = arith.constant 0 : i32
    return %arg0, %c0_i32, %c0_i32_0 : i32, i32, i32
  }
}

</mosaic_0001>

<bundles_post_ra>
// kernel: tpu_custom_call.1
= control target key start
LH: loop header
LB: loop body
LE: loop exit
PB: predicated region body
PF: predicated region fallthrough
CT: control target
= control target key end

     0   :  { %10 = vsyncpa [#allocation3], 0  ;;  %s1240_s0 = inlined_call_operand.hbm [shape: f32[2,64,256], index: 0, kind: input, shape index: {}]   ;;  %s1241_s1 = inlined_call_operand.vmem [shape: f32[64,4], index: 1, kind: input, shape index: {}]   ;;  %s1242_s2 = inlined_call_operand.vmem [shape: f32[1,4], index: 2, kind: input, shape index: {}]   ;;  %s1243_s3 = inlined_call_operand.vmem [shape: f32[4,64], index: 3, kind: input, shape index: {}]   ;;  %s1244_s4 = inlined_call_operand.vmem [shape: f32[1,64], index: 4, kind: input, shape index: {}]   ;;  %s1245_s5 = inlined_call_operand.hbm [shape: f32[2,64,256], index: 5, kind: output, shape index: {}]  }
   0x1   :  { %12 = vsyncpa [#allocation3 + $0x1], 0 }
   0x2   :  { %13 = vsyncpa [#allocation4], 0 }
   0x3   :  { %15 = vsyncpa [#allocation4 + $0x1], 0  ;;  %s946_s18 = smov 0   ;;  %s948_s19 = smov 0  }
   0x4   :  { %s950_s20 = smov 0   ;;  %s952_s21 = smov 0  }
   0x5 LB: > { %s967_s22 = sadd.s32 4294967295, %s905_s21   ;;  %s685_s23 = sadd.s32 4294967294, %s905_s21   ;;  %s905_s21 = sphi %s952_s21, %s1258_s21   ;;  %s901_s20 = sphi %s950_s20, %s1257_s20   ;;  %s897_s19 = sphi %s948_s19, %s1256_s19   ;;  %s893_s18 = sphi %s946_s18, %s1255_s18  }
   0x6   : > { %s971_s24 = sadd.s32 1, %s905_s21   ;;  %s28_s25 = sadd.s32 1, %s901_s20 }
   0x7   : > { %s25_s26 = ssub.s32 %s905_s21, %s971_s24  ;;  %p35_p0 = scmp.ne.s32.totalorder %s901_s20, %s897_s19 }
   0x8   : > { %p26_p1 = scmp.eq.s32.totalorder %s25_s26, 0  ;;  %p36_p2 = scmp.eq.s32.totalorder %s905_s21, 0 }
   0x9   : > { %p41_p3 = scmp.ne.s32.totalorder %s897_s19, %s893_s18  ;;  %p42_p4 = scmp.eq.s32.totalorder %s967_s22, 0 }
   0xa   : > { %s983_s27 = scalar_select %p26_p1, %s901_s20, %s28_s25  }
   0xb   : > { %p985_p5 = por %p36_p2, %p35_p0  ;;  %p989_p6 = por %p42_p4, %p41_p3 }
   0xc   : > { %p149_p7 = scmp.eq.s32.totalorder %s967_s22, 1  ;;  %p155_p8 = scmp.eq.s32.totalorder %s685_s23, 1 }
   0xd   : > { %p764_p10 = scmp.lt.s32.totalorder %s905_s21, 2  ;;  %s187_s7 = sand.u32 1, %s901_s20  }
   0xe   : > { %p996_p11 = por %p149_p7, %p35_p0  ;;  %p1000_p12 = por %p155_p8, %p41_p3 }
   0xf   : > { %s703_s8 = sshll.u32 %s905_s21, 11  ;;  %s688_s9 = sshll.u32 %s187_s7, 7 }
  0x10   : > { %s1249_s30 = scalar_select %p996_p11, 1, 0 }
  0x11   : > { %s1250_s6 = scalar_select %p1000_p12, 1, 0 }
  0x12   : > { %s1009_s12 = scalar_lea.hbm %s1240_s0, %s703_s8  ;;  %s191_s13 = scalar_lea.vmem [#allocation2], %s688_s9 }
  0x13   : > { %s198_s14 = sshll.u32 %s191_s13, 4  ;;  %p1013_p13 = pnand %p764_p10, %p985_p5  ;;  %s1017_s14 = int_to_ptr.vmem [resolvable:$true] %s198_s14 }
  0x14   : > { %s1019_s16 = scalar_lea.sflag [#allocation3], %s187_s7  ;;  %s809_s17 = scalar_lea.hbm %s1009_s12, 2048 }
  0x15   : > { %p810_p0 = scmp.ne.s32.totalorder %s1009_s12, %s809_s17  ;;  %p811_p1 = pneg %p1013_p13 }
  0x16   : > { %s814_s26 = scalar_lea.hbm %s1240_s0, 4096  ;;  %p815_p4 = scmp.lt.u32.totalorder %s1009_s12, %s1240_s0 }
  0x17   : > { %p812_p2 = pnand %p811_p1, %p810_p0  ;;  %p816_p5 = scmp.lt.u32.totalorder %s814_s26, %s809_s17 }
  0x18   : > { %p818_p8 = scmp.lt.u32.totalorder %s809_s17, %s1009_s12 }
  0x19   : > { %p813_p3 = pneg %p812_p2  ;;  %p817_p7 = por %p816_p5, %p815_p4 }
  0x1b   : > { %p819_p10 = por %p818_p8, %p817_p7 }
  0x1d   : > { %p820_p9 = pnand %p819_p10, %p813_p3 }
  0x1f   : > { %823 = shalt.err (!%p820_p9)
}
  0x20   : > { %s824_s7 = scalar_lea.vmem %s1017_s14, 2048  ;;  %s907_s9 = smov [#allocation2]  }
  0x21   : > { %p825_p0 = scmp.ne.s32.totalorder %s1017_s14, %s824_s7  ;;  %s829_s10 = sshll.u32 %s907_s9, 4  ;;  %s830_s10 = int_to_ptr.vmem [resolvable:$false] %s829_s10 }
  0x22   : > { %s831_s11 = scalar_lea.vmem %s830_s10, 4096  ;;  %p832_p11 = scmp.lt.s32.totalorder %s1017_s14, %s830_s10 }
  0x23   : > { %p827_p2 = pnand %p825_p0, %p811_p1  ;;  %p833_p4 = scmp.lt.s32.totalorder %s831_s11, %s824_s7 }
  0x25   : > { %p828_p12 = pneg %p827_p2  ;;  %p834_p5 = por %p833_p4, %p832_p11 }
  0x27   : > { %p835_p7 = pnand %p834_p5, %p828_p12 }
  0x29   : > { %838 = shalt.err (!%p835_p7)
}
  0x2a   : > { %s908_s13 = smov 256   ;;  %s909_s17 = smov 16  }
  0x2b   : > { %759 = dma.hbm_to_vmem [thread:$0]  (!%p1013_p13), %s1009_s12, 2048, %s1017_s14, %s1019_s16, %s908_s13, %s908_s13, %s909_s17  }
  0x2c   : > { %p691_p9 = scmp.ge.s32.totalorder %s905_s21, 1  ;;  %p206_p1 = scmp.lt.s32.totalorder %s905_s21, 3 }
  0x2e   : > { %p207_p3 = pnand %p691_p9, %p206_p1 }
  0x2f   : > { %s1050_s23 = sand.u32 (!%p207_p3), 1, %s897_s19  }
  0x30   : > { %210 = sbr.rel (%p207_p3) target bundleno = 825 (0x339), region = 40  ;;  %s692_s25 = sshll.u32 (!%p207_p3), %s1050_s23, 7 }
  0x31   : > { %s213_s26 = scalar_lea.sflag (!%p207_p3), [#allocation3], %s1050_s23  ;;  %s216_s28 = scalar_lea.vmem (!%p207_p3), [#allocation2], %s692_s25 }
  0x37   : > { %884 = dma.done.wait (%p989_p6), %s213_s26, 2048  }
  0x38   : > { %886 = vsyncadd (%p989_p6), %s213_s26, 4294965248  ;;  %v1060_v0 = vld [vmem:[%s216_s28] sm:$0xff]  ;;  %v1062_v1 = vld [vmem:[%s216_s28 + $0x8] sm:$0xff]  ;;  %v910_v27 = vmov 0.0|0.0   ;;  %vm911_vm0 = vmmov 0   ;;  %v912_v37 = vmov 0.0   ;;  %v316_v38 = vlaneseq }
  0x39   : > { %v1064_v2 = vld [vmem:[%s216_s28 + $0x20] sm:$0xff]  ;;  %v259_v3 = vadd.f32 %v1062_v1, %v1060_v0  ;;  %v1068_v4 = vld [vmem:[%s216_s28 + $0x28] sm:$0xff]  ;;  %v1070_v5 = vld [vmem:[%s216_s28 + $0x10] sm:$0xff]  ;;  %740 = vmatprep.subr.bf16.mxu0 %v910_v27  ;;  %732 = vmatprep.mubr.msk.f32.mxu0 %vm911_vm0, %v912_v37  ;;  %vm327_vm1 = vcmask 130112   ;;  %vm334_vm2 = vcmask 195712   ;;  %vm341_vm3 = vcmask 261312  }
  0x3a   : > { %v1072_v6 = vld [vmem:[%s216_s28 + $0x18] sm:$0xff]  ;;  %v265_v7 = vadd.f32 %v1068_v4, %v1064_v2  ;;  %v1076_v8 = vld [vmem:[%s216_s28 + $0x30] sm:$0xff]  ;;  %v1084_v12 = vld [vmem:[%s216_s28 + $0x40] sm:$0xff]  ;;  %735 = vmatprep.subr.mxu1 %v912_v37  ;;  %737 = vmatprep.mubr.msk.f32.mxu1 %vm911_vm0, %v912_v37  ;;  %v317_v39 = vand.u32 127, %v316_v38  ;;  %v1132_v40 = vshrl.u32 %v316_v38, 7  ;;  %vm348_vm4 = vcmask 326912  }
  0x3b   : > { %v1078_v9 = vld [vmem:[%s216_s28 + $0x38] sm:$0xff]  ;;  %260 = vadd.xlane.f32.xlu0 %v259_v3  ;;  %v262_v10 = vadd.f32 %v1072_v6, %v1070_v5  ;;  %v1086_v13 = vld [vmem:[%s216_s28 + $0x48] sm:$0xff]  ;;  %v1088_v14 = vld [vmem:[%s216_s28 + $0x50] sm:$0xff]  ;;  %vm355_vm5 = vcmask 392512   ;;  %vm362_vm6 = vcmask 458112   ;;  %vm369_vm7 = vcmask 523712  }
  0x3c   : > { %266 = vadd.xlane.f32.xlu1 %v265_v7  ;;  %v268_v11 = vadd.f32 %v1078_v9, %v1076_v8  ;;  %v1090_v15 = vld [vmem:[%s216_s28 + $0x58] sm:$0xff]  ;;  %v271_v16 = vadd.f32 %v1086_v13, %v1084_v12  ;;  %v1096_v18 = vld [vmem:[%s216_s28 + $0x60] sm:$0xff]  ;;  %v1098_v19 = vld [vmem:[%s216_s28 + $0x68] sm:$0xff]  ;;  %v322_v41 = vadd.s32 4294967288, %v317_v39  ;;  %v329_v43 = vadd.s32 4294967280, %v317_v39  ;;  %s1159_s10 = scalar_lea.vmem [#allocation5], %s692_s25 }
  0x3d   : > { %v274_v17 = vadd.f32 %v1090_v15, %v1088_v14  ;;  %v1100_v20 = vld [vmem:[%s216_s28 + $0x70] sm:$0xff]  ;;  %v1102_v21 = vld [vmem:[%s216_s28 + $0x78] sm:$0xff]  ;;  %v277_v22 = vadd.f32 %v1098_v19, %v1096_v18  ;;  %v299_v24 = vld [vmem:[%s1241_s1] sm:$0xff]  ;;  %v336_v44 = vadd.s32 4294967272, %v317_v39  ;;  %v320_v46 = vsub.s32 %v317_v39, %v1132_v40  ;;  %s704_s25 = sshll.u32 %s967_s22, 11  ;;  %s612_s11 = sshll.u32 %s1159_s10, 4  ;;  %s1192_s11 = int_to_ptr.vmem [resolvable:$true] %s612_s11 }
  0x3e   : > { %v280_v23 = vadd.f32 %v1102_v21, %v1100_v20  ;;  %v300_v25 = vld [vmem:[%s1241_s1 + $0x8] sm:$0xff]  ;;  %v301_v28 = vld [vmem:[%s1241_s1 + $0x10] sm:$0xff]  ;;  %v302_v29 = vld [vmem:[%s1241_s1 + $0x18] sm:$0xff]  ;;  %v325_v48 = vsub.s32 %v322_v41, %v1132_v40  ;;  %v343_v49 = vadd.s32 4294967264, %v317_v39  ;;  %v332_v50 = vsub.s32 %v329_v43, %v1132_v40  ;;  %s1190_s26 = scalar_lea.hbm %s1245_s5, %s704_s25  ;;  %s599_s22 = scalar_lea.sflag [#allocation4], %s1050_s23 }
  0x3f   : > { %263 = vadd.xlane.f32.xlu0 %v262_v10  ;;  %v741_v26 = vpack.c.bf16 %v300_v25, %v299_v24  ;;  %v744_v30 = vpack.c.bf16 %v302_v29, %v301_v28  ;;  %v303_v31 = vld [vmem:[%s1241_s1 + $0x20] sm:$0xff]  ;;  %v304_v32 = vld [vmem:[%s1241_s1 + $0x28] sm:$0xff]  ;;  %v305_v34 = vld [vmem:[%s1241_s1 + $0x30] sm:$0xff]  ;;  %v339_v53 = vsub.s32 %v336_v44, %v1132_v40  ;;  %v350_v54 = vadd.s32 4294967256, %v317_v39  ;;  %s839_s28 = scalar_lea.vmem %s1192_s11, 2048  ;;  %p1252_p11 = scmp.ne.s32.totalorder %s1249_s30, 0 }
  0x40   : > { %269 = vadd.xlane.f32.xlu1 %v268_v11  ;;  %v747_v33 = vpack.c.bf16 %v304_v32, %v303_v31  ;;  %v306_v35 = vld [vmem:[%s1241_s1 + $0x38] sm:$0xff]  ;;  %v346_v60 = vsub.s32 %v343_v49, %v1132_v40  ;;  %v357_v61 = vadd.s32 4294967248, %v317_v39  ;;  %v364_v10 = vadd.s32 4294967240, %v317_v39  ;;  %v445_v39 = vld [vmem:[%s1243_s3] sm:$0xf]  ;;  %p840_p6 = scmp.ne.s32.totalorder %s1192_s11, %s839_s28  ;;  %s913_s29 = smov [#allocation5]  }
  0x41   : > { %742 = vmatpush3.bf16.msra.mxu0 %v741_v26  ;;  %v750_v36 = vpack.c.bf16 %v306_v35, %v305_v34  ;;  %v353_v7 = vsub.s32 %v350_v54, %v1132_v40  ;;  %vm371_vm8 = vcmask 523264   ;;  %vm451_vm9 = vcmask 1043456   ;;  %v307_v41 = vld [vmem:[%s1242_s2] sm:$0x1]  ;;  %s843_s12 = sshll.u32 %s913_s29, 4  ;;  %s844_s12 = int_to_ptr.vmem [resolvable:$false] %s843_s12 }
  0x42   : > { %743 = vmatprep.subr.bf16.mxu0 %v910_v27  ;;  %v360_v26 = vsub.s32 %v357_v61, %v1132_v40  ;;  %v367_v29 = vsub.s32 %v364_v10, %v1132_v40  ;;  %736 = vmatpush3.msk.msra.mxu1 %vm451_vm9, %v445_v39  ;;  %vm447_vm10 = vcmask 31744   ;;  %p841_p12 = pnand %p840_p6, %p1252_p11  ;;  %s845_s14 = scalar_lea.vmem %s844_s12, 4096 }
  0x43   : > { %272 = vadd.xlane.f32.xlu0 %v271_v16  ;;  %p846_p8 = scmp.lt.s32.totalorder %s1192_s11, %s844_s12  ;;  %p847_p10 = scmp.lt.s32.totalorder %s845_s14, %s839_s28 }
  0x44   : > { %275 = vadd.xlane.f32.xlu1 %v274_v17  ;;  %p842_p13 = pneg %p841_p12 }
  0x45   : > { %745 = vmatpush3.bf16.msra.mxu0 %v744_v30  ;;  %p848_p0 = por %p847_p10, %p846_p8 }
  0x46   : > { %746 = vmatprep.subr.bf16.mxu0 %v910_v27 }
  0x47   : > { %278 = vadd.xlane.f32.xlu0 %v277_v22  ;;  %p849_p2 = pnand %p848_p0, %p842_p13 }
  0x48   : > { %281 = vadd.xlane.f32.xlu1 %v280_v23 }
  0x49   : > { %748 = vmatpush3.bf16.msra.mxu0 %v747_v33 }
  0x4a   : > { %749 = vmatprep.subr.bf16.mxu0 %v910_v27 }
  0x4d   : > { %751 = vmatpush3.bf16.msra.mxu0 %v750_v36 }
  0xc8   : > { %v261_v42 = vpop.xlane.xlu0 %260 }
  0xc9   : > { %v267_v45 = vpop.xlane.xlu1 %266  ;;  %v291_v47 = vmul.f32 0.00390625, %v261_v42 }
  0xca   : > { %v293_v51 = vmul.f32 0.00390625, %v267_v45 }
  0xcb   : > { %v321_v58 = vrot.slane %v291_v47, %v320_v46  ;;  %v446_v46 = vld [vmem:[%s1244_s4] sm:$0x1] }
  0xcc   : > { %v264_v52 = vpop.xlane.xlu0 %263  ;;  %v333_v62 = vrot.slane %v293_v51, %v332_v50 }
  0xcd   : > { %v292_v55 = vmul.f32 0.00390625, %v264_v52  ;;  %v270_v56 = vpop.xlane.xlu1 %269 }
  0xce   : > { %v294_v57 = vmul.f32 0.00390625, %v270_v56 }
  0xcf   : > { %v326_v59 = vrot.slane %v292_v55, %v325_v48 }
  0xd0   : > { %v340_v63 = vrot.slane %v294_v57, %v339_v53  ;;  %v273_v3 = vpop.xlane.xlu0 %272  ;;  %v533_v53 = vsub.s32 0, %v1132_v40 }
  0xd1   : > { %v328_v11 = vsel %vm327_vm1, %v326_v59, %v321_v58  ;;  %v295_v16 = vmul.f32 0.00390625, %v273_v3  ;;  %v276_v17 = vpop.xlane.xlu1 %275 }
  0xd2   : > { %v335_v22 = vsel %vm334_vm2, %v333_v62, %v328_v11  ;;  %v296_v23 = vmul.f32 0.00390625, %v276_v17 }
  0xd3   : > { %v342_v24 = vsel %vm341_vm3, %v340_v63, %v335_v22  ;;  %v347_v25 = vrot.slane %v295_v16, %v346_v60 }
  0xd4   : > { %v354_v27 = vrot.slane %v296_v23, %v353_v7  ;;  %v279_v28 = vpop.xlane.xlu0 %278 }
  0xd5   : > { %v349_v30 = vsel %vm348_vm4, %v347_v25, %v342_v24  ;;  %v297_v31 = vmul.f32 0.00390625, %v279_v28  ;;  %v282_v32 = vpop.xlane.xlu1 %281 }
  0xd6   : > { %v298_v33 = vmul.f32 0.00390625, %v282_v32  ;;  %v356_v35 = vsel %vm355_vm5, %v354_v27, %v349_v30 }
  0xd7   : > { %v361_v34 = vrot.slane %v297_v31, %v360_v26 }
  0xd8   : > { %v368_v36 = vrot.slane %v298_v33, %v367_v29 }
  0xd9   : > { %v363_v37 = vsel %vm362_vm6, %v361_v34, %v356_v35 }
  0xda   : > { %v370_v38 = vsel %vm369_vm7, %v368_v36, %v363_v37 }
  0xdb   : > { %733 = vmatmul.mubr.msk.f32.vlgmr.msra.gmra.mrb[0].mxu0 %vm371_vm8, %v370_v38 }
 0x1ae   : > { %v440_v42 = vpop.f32.mrb[0].mxu0 }
 0x1af   : > { %v441_v43 = vadd.f32 %v440_v42, %v307_v41  ;;  %v734_v44 = vpop.f32.mrb[1].mxu0 }
 0x1b1   : > { %v444_v45 = vmax.f32 %v441_v43, 0.0 }
 0x1b3   : > { %738 = vmatmul.mubr.msk.f32.vlgmr.msra.gmra.mrb[0].mxu1 %vm447_vm10, %v444_v45 }
 0x286   : > { %v521_v47 = vpop.f32.mrb[0].mxu1 }
 0x287   : > { %v522_v48 = vadd.f32 %v521_v47, %v446_v46  ;;  %v739_v49 = vpop.f32.mrb[1].mxu1 }
 0x289   : > { %v697_v50 = vmul.f32 -1.442695, %v522_v48 }
 0x28b   : > { %805 = vpow2.f32 %v697_v50 }
 0x295   : > { %v806_v51 = vpop.eup %805 }
 0x296   : > { %v528_v52 = vadd.f32 1.0, %v806_v51 }
 0x298   : > { %807 = vrcp.f32 %v528_v52 }
 0x2a2   : > { %v808_v54 = vpop.eup %807 }
 0x2a3   : > { %v534_v55 = vrot.slane %v808_v54, %v533_v53 }
 0x2a5   : > { %540 = vbcast.lane.b32.xlu1 %v534_v55, 264  ;;  %536 = vbcast.lane.b32.xlu0 %v534_v55, 256 }
 0x2a9   : > { %544 = vbcast.lane.b32.xlu1 %v534_v55, 272  ;;  %552 = vbcast.lane.b32.xlu0 %v534_v55, 288 }
 0x2ad   : > { %548 = vbcast.lane.b32.xlu1 %v534_v55, 280  ;;  %560 = vbcast.lane.b32.xlu0 %v534_v55, 304 }
 0x2b1   : > { %556 = vbcast.lane.b32.xlu1 %v534_v55, 296 }
 0x2b5   : > { %564 = vbcast.lane.b32.xlu1 %v534_v55, 312 }
 0x317   : > { %v541_v56 = vpop.permute.xlu1 %540  ;;  %v537_v57 = vpop.permute.xlu0 %536 }
 0x318   : > { %v568_v58 = vmul.f32 %v541_v56, %v1070_v5  ;;  %v569_v59 = vmul.f32 %v541_v56, %v1072_v6  ;;  %v566_v60 = vmul.f32 %v537_v57, %v1060_v0  ;;  %v567_v40 = vmul.f32 %v537_v57, %v1062_v1 }
 0x31a   : > { %584 = vst [vmem:[%s1159_s10 + $0x10] sm:$0xff] %v568_v58  ;;  %585 = vst [vmem:[%s1159_s10 + $0x18] sm:$0xff] %v569_v59 }
 0x31b   : > { %582 = vst [vmem:[%s1159_s10] sm:$0xff] %v566_v60  ;;  %583 = vst [vmem:[%s1159_s10 + $0x8] sm:$0xff] %v567_v40  ;;  %v545_v5 = vpop.permute.xlu1 %544  ;;  %v553_v0 = vpop.permute.xlu0 %552 }
 0x31c   : > { %v570_v1 = vmul.f32 %v545_v5, %v1064_v2  ;;  %v571_v6 = vmul.f32 %v545_v5, %v1068_v4  ;;  %v574_v61 = vmul.f32 %v553_v0, %v1084_v12  ;;  %v575_v62 = vmul.f32 %v553_v0, %v1086_v13 }
 0x31e   : > { %586 = vst [vmem:[%s1159_s10 + $0x20] sm:$0xff] %v570_v1  ;;  %587 = vst [vmem:[%s1159_s10 + $0x28] sm:$0xff] %v571_v6 }
 0x31f   : > { %590 = vst [vmem:[%s1159_s10 + $0x40] sm:$0xff] %v574_v61  ;;  %591 = vst [vmem:[%s1159_s10 + $0x48] sm:$0xff] %v575_v62  ;;  %v549_v63 = vpop.permute.xlu1 %548  ;;  %v561_v3 = vpop.permute.xlu0 %560 }
 0x320   : > { %v572_v2 = vmul.f32 %v549_v63, %v1076_v8  ;;  %v573_v7 = vmul.f32 %v549_v63, %v1078_v9  ;;  %v578_v4 = vmul.f32 %v561_v3, %v1096_v18  ;;  %v579_v12 = vmul.f32 %v561_v3, %v1098_v19 }
 0x322   : > { %588 = vst [vmem:[%s1159_s10 + $0x30] sm:$0xff] %v572_v2  ;;  %589 = vst [vmem:[%s1159_s10 + $0x38] sm:$0xff] %v573_v7 }
 0x323   : > { %594 = vst [vmem:[%s1159_s10 + $0x60] sm:$0xff] %v578_v4  ;;  %595 = vst [vmem:[%s1159_s10 + $0x68] sm:$0xff] %v579_v12  ;;  %v557_v13 = vpop.permute.xlu1 %556 }
 0x324   : > { %v576_v10 = vmul.f32 %v557_v13, %v1088_v14  ;;  %v577_v11 = vmul.f32 %v557_v13, %v1090_v15 }
 0x326   : > { %592 = vst [vmem:[%s1159_s10 + $0x50] sm:$0xff] %v576_v10  ;;  %593 = vst [vmem:[%s1159_s10 + $0x58] sm:$0xff] %v577_v11 }
 0x327   : > { %v565_v8 = vpop.permute.xlu1 %564 }
 0x328   : > { %v580_v9 = vmul.f32 %v565_v8, %v1100_v20  ;;  %v581_v14 = vmul.f32 %v565_v8, %v1102_v21 }
 0x32a   : > { %596 = vst [vmem:[%s1159_s10 + $0x70] sm:$0xff] %v580_v9  ;;  %597 = vst [vmem:[%s1159_s10 + $0x78] sm:$0xff] %v581_v14 }
 0x32b   : > { %852 = shalt.err (!%p849_p2)
}
 0x32c   : > { %s853_s15 = scalar_lea.hbm %s1190_s26, 2048  ;;  %s857_s7 = scalar_lea.hbm %s1245_s5, 4096 }
 0x32d   : > { %p854_p4 = scmp.ne.s32.totalorder %s1190_s26, %s853_s15  ;;  %p858_p9 = scmp.lt.u32.totalorder %s1190_s26, %s1245_s5 }
 0x32e   : > { %p859_p1 = scmp.lt.u32.totalorder %s857_s7, %s853_s15  ;;  %p861_p6 = scmp.lt.u32.totalorder %s853_s15, %s1190_s26 }
 0x32f   : > { %p855_p5 = pnand %p854_p4, %p1252_p11 }
 0x330   : > { %p860_p3 = por %p859_p1, %p858_p9 }
 0x331   : > { %p856_p7 = pneg %p855_p5 }
 0x332   : > { %p862_p12 = por %p861_p6, %p860_p3 }
 0x334   : > { %p863_p13 = pnand %p862_p12, %p856_p7 }
 0x336   : > { %866 = shalt.err (!%p863_p13)
}
 0x337   : > { %s914_s25 = smov 256   ;;  %s915_s13 = smov 16  }
 0x338   : > { %754 = dma.vmem_to_hbm [thread:$0]  (%p1252_p11), %s1192_s11, 2048, %s1190_s26, %s599_s22, %s914_s25, %s914_s25, %s915_s13  }
 0x339 PF: > { %s627_s17 = sand.u32 1, %s893_s18   ;;  %p1253_p8 = scmp.ne.s32.totalorder %s1250_s6, 0 }
 0x33a   : > { %p1254_p10 = scmp.ge.s32.totalorder %s905_s21, 2  ;;  %s628_s28 = scalar_lea.sflag [#allocation4], %s627_s17 }
 0x33c   : > { %p761_p0 = pnand %p1254_p10, %p1253_p8 }
 0x33e   : > { %888 = dma.done.wait (!%p761_p0), %s628_s28, 2048  }
 0x33f   : > { %890 = vsyncadd (!%p761_p0), %s628_s28, 4294965248  ;;  %p18_p2 = scmp.ge.s32.totalorder %s971_s24, 4   ;;  %s1255_s18 = smov %s897_s19 }
 0x340   : > { %s1256_s19 = smov %s901_s20  ;;  %s1257_s20 = smov %s983_s27 }
 0x341   : > { %s1258_s21 = smov %s971_s24  ;;  %20 = sbr.rel (!%p18_p2) target bundleno = 5 (0x5), region = 85 }
 0x348   :  { %633 = vsyncpa [#allocation3], 1 }
 0x349   :  { %635 = vsyncpa [#allocation3 + $0x1], 1 }
 0x34a   :  { %636 = vsyncpa [#allocation4], 1 }
 0x34b   :  { %638 = vsyncpa [#allocation4 + $0x1], 1 }

</bundles_post_ra>
